<compile_context>
chip_gen: v5e
topology: v5e:2x2
jax: 0.10.0
libtpu: 0.0.40
codegen_flags: <defaults>
</compile_context>

<pallas_src>
import jax
import jax.numpy as jnp
from jax.experimental import pallas as pl
from jax.experimental.pallas import tpu as pltpu

_LANE = 128


def _gaussian_act_kernel(params_ref, x_ref, o_ref):
    # params_ref (SMEM, scalar-prefetched): [a, mu, gamma_l, gamma_r], f32, clamped.
    a = params_ref[0]
    mu = params_ref[1]
    gamma_l = params_ref[2]
    gamma_r = params_ref[3]

    x = x_ref[...].astype(jnp.float32)
    left = x < mu
    d = x - mu
    d2 = d * d

    # Single transcendental per element: select gamma first (VPU), exp once (EUP).
    gamma = jnp.where(left, gamma_l, gamma_r)
    e = jnp.exp(-gamma * d2)
    out = jnp.where(left, a * e, 1.0 + (a - 1.0) * e)

    o_ref[...] = out.astype(o_ref.dtype)


def _clamped_params(a, mu, gamma_l, gamma_r):
    a = jnp.clip(jnp.asarray(a, jnp.float32), 1.01, 6.0)
    mu = jnp.clip(jnp.asarray(mu, jnp.float32), 0.1, 3.0)
    gamma_l = jnp.clip(jnp.asarray(gamma_l, jnp.float32), 0.5, 2.0)
    gamma_r = jnp.clip(jnp.asarray(gamma_r, jnp.float32), 0.5, 2.0)
    return a, mu, gamma_l, gamma_r


def _pick_tile_rows(rows, tile_rows):
    """Block height: multiple of 32 rows, and >= ~8 grid blocks when possible."""
    if rows < 64:
        return rows                                   # full-extent block (tiny input)
    want = min(int(tile_rows), pl.cdiv(rows, 8))      # aim for >= 8 grid blocks
    tr = max(32, (want // 32) * 32)                   # 32-row alignment (bf16/int8 friendly)
    return min(tr, rows)


def gaussian_activation(x, a, mu, gamma_l, gamma_r, *, tile_rows=8192):
    """Piecewise-Gaussian activation matching the PyTorch module's forward.

    x: any-shape float tensor. Returns same shape/dtype.
    """
    a, mu, gamma_l, gamma_r = _clamped_params(a, mu, gamma_l, gamma_r)
    params = jnp.stack([a, mu, gamma_l, gamma_r]).astype(jnp.float32)

    orig_shape = x.shape
    orig_dtype = x.dtype
    total = int(x.size)

    x_flat = jnp.reshape(x, (-1,))

    main = (total // _LANE) * _LANE   # lane-aligned prefix handled by the kernel
    rows = main // _LANE

    pieces = []

    if rows > 0:
        x2d = jnp.reshape(x_flat if main == total else x_flat[:main], (rows, _LANE))

        tr = _pick_tile_rows(rows, tile_rows)
        grid = (pl.cdiv(rows, tr),)        # partial trailing block is masked by Pallas

        # Size the scoped VMEM for double-buffered in+out blocks (+ slack).
        in_bytes = tr * _LANE * x2d.dtype.itemsize
        out_bytes = tr * _LANE * jnp.dtype(orig_dtype).itemsize
        vmem_limit = 2 * (in_bytes + out_bytes) + (4 << 20)
        vmem_limit = int(min(max(vmem_limit, 16 << 20), 48 << 20))

        out2d = pl.pallas_call(
            _gaussian_act_kernel,
            out_shape=jax.ShapeDtypeStruct((rows, _LANE), orig_dtype),
            grid_spec=pltpu.PrefetchScalarGridSpec(
                num_scalar_prefetch=1,                 # params -> SMEM before grid runs
                grid=grid,
                in_specs=[pl.BlockSpec((tr, _LANE), lambda i, params: (i, 0))],
                out_specs=pl.BlockSpec((tr, _LANE), lambda i, params: (i, 0)),
            ),
            compiler_params=pltpu.CompilerParams(
                dimension_semantics=("parallel",),     # shards grid across v7x cores
                vmem_limit_bytes=vmem_limit,
            ),
        )(params, x2d)
        pieces.append(jnp.reshape(out2d, (-1,)))

    if main < total:
        # Small (<128 elem) ragged tail handled in plain JAX.
        tail = x_flat[main:].astype(jnp.float32)
        left = tail < mu
        d2 = (tail - mu) ** 2
        e = jnp.exp(-jnp.where(left, gamma_l, gamma_r) * d2)
        tail_out = jnp.where(left, a * e, 1.0 + (a - 1.0) * e).astype(orig_dtype)
        pieces.append(tail_out)

    out_flat = pieces[0] if len(pieces) == 1 else jnp.concatenate(pieces)
    return jnp.reshape(out_flat, orig_shape)


def _reference(x, a, mu, gamma_l, gamma_r):
    a, mu, gamma_l, gamma_r = _clamped_params(a, mu, gamma_l, gamma_r)
    xf = x.astype(jnp.float32)
    left = xf < mu
    g_left = jnp.where(left, a * jnp.exp(-gamma_l * (xf - mu) ** 2), 0.0)
    g_right = jnp.where(~left, 1.0 + (a - 1.0) * jnp.exp(-gamma_r * (xf - mu) ** 2), 0.0)
    return (g_left + g_right).astype(x.dtype)


if __name__ == "__main__":
    key = jax.random.PRNGKey(0)

    # Module "parameters" (the __init__ args): scalars.
    a, mu, gamma_l, gamma_r = 1.1, 1.0, 1.0, 1.0

    # Test 1: NCHW tensor like the generator uses (lane-aligned, single block).
    x = jax.random.normal(key, (2, 4, 16, 16), dtype=jnp.float32) * 2.0
    out = jax.block_until_ready(gaussian_activation(x, a, mu, gamma_l, gamma_r))
    ref = _reference(x, a, mu, gamma_l, gamma_r)
    assert out.shape == x.shape and out.dtype == x.dtype
    assert jnp.allclose(out, ref, atol=1e-5, rtol=1e-5), "mismatch vs reference (main)"

    # Test 2: non-lane-aligned total (exercises the plain-JAX tail path).
    x2 = jax.random.normal(jax.random.PRNGKey(1), (2, 3, 17, 13), dtype=jnp.float32) * 2.0
    out2 = jax.block_until_ready(gaussian_activation(x2, a, mu, gamma_l, gamma_r))
    ref2 = _reference(x2, a, mu, gamma_l, gamma_r)
    assert out2.shape == x2.shape and out2.dtype == x2.dtype
    assert jnp.allclose(out2, ref2, atol=1e-5, rtol=1e-5), "mismatch vs reference (tail)"

    # Test 3: larger tensor -> multi-block grid (rows=200, tr=32, 7 blocks,
    # partial trailing block) exercising pipelining + block masking.
    x3 = jax.random.normal(jax.random.PRNGKey(2), (2, 8, 40, 40), dtype=jnp.float32) * 2.0
    out3 = jax.block_until_ready(gaussian_activation(x3, a, mu, gamma_l, gamma_r))
    ref3 = _reference(x3, a, mu, gamma_l, gamma_r)
    assert out3.shape == x3.shape and out3.dtype == x3.dtype
    assert jnp.allclose(out3, ref3, atol=1e-5, rtol=1e-5), "mismatch vs reference (multi-block)"

    print("KERNEL_OK")
</pallas_src>

<mosaic_0001>
module attributes {stable_mosaic.version = 11 : i64} {
  func.func @_gaussian_act_kernel(%arg0: i32, %arg1: memref<4xf32, #tpu.memory_space<smem>>, %arg2: memref<16x128xf32, #tpu.memory_space<vmem>>, %arg3: memref<16x128xf32, #tpu.memory_space<vmem>>) attributes {dimension_semantics = [#tpu.dimension_semantics<parallel>], iteration_bounds = array<i64: 1>, scalar_prefetch = 1 : i64, scratch_operands = 0 : i64, tpu.core_type = #tpu.core_type<tc>, window_params = [{transform_indices = @transform_0, window_bounds = array<i64: 16, 128>}, {transform_indices = @transform_1, window_bounds = array<i64: 16, 128>}]} {
    %c0 = arith.constant 0 : index
    %0 = memref.load %arg1[%c0] : memref<4xf32, #tpu.memory_space<smem>>
    %c1 = arith.constant 1 : index
    %1 = memref.load %arg1[%c1] : memref<4xf32, #tpu.memory_space<smem>>
    %c2 = arith.constant 2 : index
    %2 = memref.load %arg1[%c2] : memref<4xf32, #tpu.memory_space<smem>>
    %c3 = arith.constant 3 : index
    %3 = memref.load %arg1[%c3] : memref<4xf32, #tpu.memory_space<smem>>
    %c0_0 = arith.constant 0 : index
    %c0_1 = arith.constant 0 : index
    %4 = vector.load %arg2[%c0_0, %c0_1] : memref<16x128xf32, #tpu.memory_space<vmem>>, vector<16x128xf32>
    %5 = vector.broadcast %1 : f32 to vector<16x128xf32>
    %6 = arith.cmpf olt, %4, %5 : vector<16x128xf32>
    %7 = vector.broadcast %1 : f32 to vector<16x128xf32>
    %8 = arith.subf %4, %7 : vector<16x128xf32>
    %9 = arith.mulf %8, %8 : vector<16x128xf32>
    %10 = vector.broadcast %2 : f32 to vector<16x128xf32>
    %11 = vector.broadcast %3 : f32 to vector<16x128xf32>
    %12 = arith.select %6, %10, %11 : vector<16x128xi1>, vector<16x128xf32>
    %cst = arith.constant 0.000000e+00 : f32
    %13 = vector.broadcast %cst : f32 to vector<16x128xf32>
    %14 = arith.subf %13, %12 : vector<16x128xf32>
    %15 = arith.mulf %14, %9 : vector<16x128xf32>
    %16 = math.exp %15 : vector<16x128xf32>
    %17 = vector.broadcast %0 : f32 to vector<16x128xf32>
    %18 = arith.mulf %17, %16 : vector<16x128xf32>
    %cst_2 = arith.constant 1.000000e+00 : f32
    %19 = arith.subf %0, %cst_2 : f32
    %20 = vector.broadcast %19 : f32 to vector<16x128xf32>
    %21 = arith.mulf %20, %16 : vector<16x128xf32>
    %cst_3 = arith.constant 1.000000e+00 : f32
    %22 = vector.broadcast %cst_3 : f32 to vector<16x128xf32>
    %23 = arith.addf %22, %21 : vector<16x128xf32>
    %24 = arith.select %6, %18, %23 : vector<16x128xi1>, vector<16x128xf32>
    %c0_4 = arith.constant 0 : index
    %c0_5 = arith.constant 0 : index
    %25 = vector.load %arg3[%c0_4, %c0_5] : memref<16x128xf32, #tpu.memory_space<vmem>>, vector<16x128xf32>
    tpu.vector_store %arg3[%c0_4, %c0_5], %24 {strides = array<i32>} : memref<16x128xf32, #tpu.memory_space<vmem>>, vector<16x128xf32>,
    return
  }
  func.func @transform_0(%arg0: i32, %arg1: memref<4xf32, #tpu.memory_space<smem>>) -> (i32, i32) {
    %c0_i32 = arith.constant 0 : i32
    %c0_i32_0 = arith.constant 0 : i32
    return %arg0, %c0_i32 : i32, i32
  }
  func.func @transform_1(%arg0: i32, %arg1: memref<4xf32, #tpu.memory_space<smem>>) -> (i32, i32) {
    %c0_i32 = arith.constant 0 : i32
    %c0_i32_0 = arith.constant 0 : i32
    return %arg0, %c0_i32 : i32, i32
  }
}

</mosaic_0001>

<bundles_post_ra>
// kernel: tpu_custom_call.1
= control target key start
LH: loop header
LB: loop body
LE: loop exit
PB: predicated region body
PF: predicated region fallthrough
CT: control target
= control target key end

     0   :  { %s170_s12 = smov [#allocation3]   ;;  %s209_s0 = inlined_call_operand.hbm [shape: f32[4], index: 0, kind: input, shape index: {}]   ;;  %s210_s1 = inlined_call_operand.hbm [shape: f32[16,128], index: 1, kind: input, shape index: {}]   ;;  %s211_s2 = inlined_call_operand.hbm [shape: f32[16,128], index: 2, kind: output, shape index: {}]  }
   0x1   :  { %s8_s11 = sshll.u32 %s209_s0, 4  ;;  %s9_s11 = int_to_ptr.hbm [resolvable:$true] %s8_s11 }
   0x2   :  { %11 = dma.hbm_to_smem %s9_s11, 16, %s170_s12, [#allocation2] }
   0x3   :  { %164 = dma.done.wait [#allocation2], 16 }
   0x4   :  { %165 = vsyncadd [#allocation2], 4294967280 }
   0x5   :  { %14 = sfence }
   0x6   :  { %15 = vsyncpa [#allocation5], 0 }
   0x7   :  { %16 = vsyncpa [#allocation6], 0  ;;  %s21_s15 = sshll.u32 %s210_s1, 4  ;;  %s171_s16 = smov [#allocation4]   ;;  %s22_s15 = int_to_ptr.hbm [resolvable:$true] %s21_s15 }
   0x8   :  { %s23_s17 = sshll.u32 %s171_s16, 4  ;;  %s172_s18 = smov 128   ;;  %s24_s17 = int_to_ptr.vmem [resolvable:$true] %s23_s17 }
   0x9   :  { %s173_s19 = smov 8  }
   0xa   :  { %29 = dma.hbm_to_vmem [thread:$0]  %s22_s15, 256, %s24_s17, [#allocation5], %s172_s18, %s172_s18, %s173_s19  }
   0xb   :  { %166 = dma.done.wait [#allocation5], 256  }
   0xc   :  { %167 = vsyncadd [#allocation5], 4294967040  ;;  %s91_s0 = sld [smem:[#allocation3 + $0x1]]  ;;  %v38_v0 = vld [vmem:[#allocation4] sm:$0xff]  ;;  %v39_v1 = vld [vmem:[#allocation4 + $0x8] sm:$0xff]  ;;  %s174_s23 = smov [#allocation7]  }
   0xd   :  { %s92_s20 = sld [smem:[#allocation3 + $0x2]]  ;;  %s76_s24 = sshll.u32 %s174_s23, 4  ;;  %s77_s24 = int_to_ptr.vmem [resolvable:$true] %s76_s24 }
   0xe   :  { %s93_s21 = sld [smem:[#allocation3 + $0x3]]  ;;  %s78_s27 = sshll.u32 %s211_s2, 4  ;;  %s79_s27 = int_to_ptr.hbm [resolvable:$true] %s78_s27 }
   0xf   :  { %s34_s1 = sld [smem:[#allocation3]] }
  0x12   :  { %v40_v2 = vstv %s91_s0 }
  0x13   :  { %vm41_vm0 = vcmp.lt.f32.partialorder %v38_v0, %v40_v2  ;;  %v43_v3 = vsub.f32 %v38_v0, %v40_v2  ;;  %v47_v4 = vstv %s92_s20  ;;  %vm42_vm1 = vcmp.lt.f32.partialorder %v39_v1, %v40_v2 }
  0x14   :  { %v48_v5 = vstv %s93_s21  ;;  %v44_v6 = vsub.f32 %v39_v1, %v40_v2 }
  0x15   :  { %v45_v7 = vmul.f32 %v43_v3, %v43_v3  ;;  %v49_v8 = vsel %vm41_vm0, %v47_v4, %v48_v5  ;;  %v50_v9 = vsel %vm42_vm1, %v47_v4, %v48_v5  ;;  %s94_s22 = sadd.f32 -1.0, %s34_s1  ;;  %v59_v17 = vstv %s34_s1 }
  0x16   :  { %v51_v10 = vsub.f32 0.0, %v49_v8  ;;  %v46_v11 = vmul.f32 %v44_v6, %v44_v6  ;;  %v52_v12 = vsub.f32 0.0, %v50_v9 }
  0x17   :  { %v63_v18 = vstv %s94_s22 }
  0x18   :  { %v53_v13 = vmul.f32 %v51_v10, %v45_v7  ;;  %v54_v14 = vmul.f32 %v52_v12, %v46_v11 }
  0x1a   :  { %v55_v15 = vmul.f32 1.442695, %v53_v13  ;;  %v57_v16 = vmul.f32 1.442695, %v54_v14 }
  0x1c   :  { %100 = vpow2.f32 %v55_v15 }
  0x1d   :  { %102 = vpow2.f32 %v57_v16 }
  0x22   :  { %v101_v19 = vpop.eup %100 }
  0x23   :  { %v103_v20 = vpop.eup %102  ;;  %v60_v21 = vmul.f32 %v101_v19, %v59_v17  ;;  %v64_v22 = vmul.f32 %v101_v19, %v63_v18 }
  0x24   :  { %v61_v23 = vmul.f32 %v103_v20, %v59_v17  ;;  %v65_v24 = vmul.f32 %v103_v20, %v63_v18 }
  0x25   :  { %v66_v25 = vadd.f32 1.0, %v64_v22 }
  0x26   :  { %v67_v26 = vadd.f32 1.0, %v65_v24 }
  0x27   :  { %v68_v27 = vsel %vm41_vm0, %v60_v21, %v66_v25 }
  0x28   :  { %70 = vst [vmem:[#allocation7] sm:$0xff] %v68_v27  ;;  %v69_v28 = vsel %vm42_vm1, %v61_v23, %v67_v26 }
  0x29   :  { %71 = vst [vmem:[#allocation7 + $0x8] sm:$0xff] %v69_v28 }
  0x2a   :  { %84 = dma.vmem_to_hbm [thread:$0]  %s77_s24, 256, %s79_s27, [#allocation6], %s172_s18, %s172_s18, %s173_s19  }
  0x2b   :  { %168 = dma.done.wait [#allocation6], 256  }
  0x2c   :  { %169 = vsyncadd [#allocation6], 4294967040 }
  0x2d   :  { %89 = vsyncpa [#allocation5], 1 }
  0x2e   :  { %90 = vsyncpa [#allocation6], 1 }

</bundles_post_ra>
